<compile_context>
chip_gen: v6e
topology: v6e:2x2x1
jax: 0.10.0
libtpu: 0.0.40
codegen_flags: <defaults>
</compile_context>

<pallas_src>
import functools

import jax
import jax.numpy as jnp
from jax.experimental import pallas as pl
from jax.experimental.pallas import tpu as pltpu


def _label_smoothing_kernel(pred_ref, tgt_ref, out_ref, acc_ref, *,
                            num_classes, smoothing, confidence,
                            total_batch, block_b, tiles_per_core):
    core = pl.program_id(0)          # parallel axis (both TCs on multi-TC chips)
    i = pl.program_id(1)             # batch-tile reduction axis
    nb = pl.num_programs(1)

    # Zero the per-core vector accumulator at the start of its reduction.
    @pl.when(i == 0)
    def _():
        acc_ref[...] = jnp.zeros_like(acc_ref)

    off = smoothing / (num_classes - 1)

    # ---- fused label-smoothing cross entropy ----
    # row_loss = log(sum exp(x)) - sum(w * x), x = p - max(p), sum(w) == 1.
    p = pred_ref[...]                                            # (bt, C) in dtype
    m = jnp.max(p, axis=-1, keepdims=True)                       # (bt, 1) in dtype
    x = (p - m).astype(jnp.float32)                              # single f32 (bt,C)

    lse = jnp.log(jnp.sum(jnp.exp(x), axis=-1, keepdims=True))   # (bt, 1)

    labels = tgt_ref[...]                                        # (bt, 1) int32
    cols = jax.lax.broadcasted_iota(jnp.int32, (1, num_classes), 1)  # (1, C)
    w = jnp.where(cols == labels, confidence, off)               # (bt, C) f32
    wsum = jnp.sum(w * x, axis=-1, keepdims=True)                # (bt, 1)

    row_loss = lse - wsum                                        # (bt, 1)

    # Mask rows that are batch padding.
    row0 = (core * tiles_per_core + i) * block_b
    rows = row0 + jax.lax.broadcasted_iota(jnp.int32, (block_b, 1), 0)
    acc_ref[...] += jnp.where(rows < total_batch, row_loss, 0.0)

    # Final step for this core: one reduce + one lane-dense (8,128) store.
    @pl.when(i == nb - 1)
    def _():
        total = jnp.sum(acc_ref[...], keepdims=True)             # (1, 1)
        out_ref[...] = jnp.broadcast_to(total, out_ref.shape)    # (8, 128)


def _tpu_generation_params():
    """Return (vmem_budget_bytes, vmem_limit_bytes, tensorcores_per_chip)."""
    kind = ""
    try:
        kind = jax.devices()[0].device_kind.lower()
    except Exception:
        pass
    phys = None
    try:
        phys = int(pltpu.get_tpu_info().vmem_capacity_bytes)
    except Exception:
        phys = None
    if phys is None:
        # v5e/v6e have 128 MiB VMEM; v7x has 64 MiB/TC. Unknown -> conservative.
        phys = (128 << 20) if ("v5" in kind or "v6" in kind) else (64 << 20)

    if "v2" in kind or "v3" in kind:           # small-VMEM legacy chips
        budget, limit = 8 << 20, 12 << 20
    elif phys >= (128 << 20):                  # v5e / v6e: exploit full VMEM
        budget, limit = 64 << 20, 96 << 20
    else:                                      # v7x (64 MiB): leave headroom
        budget, limit = 28 << 20, 40 << 20

    # 2-way "parallel" grid split only pays off on multi-TensorCore chips
    # (v4 megacore, v7x); on 1-TC chips it is just a serial loop + extra padding.
    n_cores = 2 if ("v4" in kind or "7" in kind) else 1
    return budget, limit, n_cores


def _choose_block_b(batch, num_classes, itemsize, vmem_budget, sublane_pack):
    # Per-row VMEM: double-buffered pred DMA (2*itemsize*C) + ~2 live f32
    # (bt, C) intermediates (x and the weighted/exp temp) + ~8 lane-padded
    # (bt, 1) f32 stats (512 B each after lane padding to 128).
    per_row = num_classes * (2 * itemsize + 2 * 4) + 8 * 512
    cap = max(sublane_pack, vmem_budget // per_row)
    # Aim for >= ~4 MiB of pred per grid step so the ~0.35 us fixed per-step
    # overhead stays <5% even at v7x's 3.2 TB/s HBM feed.
    want = max(512, (4 << 20) // max(1, num_classes * itemsize))
    bb = min(cap, want, 2048)                  # hard cap bounds vreg pressure
    bb = min(bb, -(-batch // sublane_pack) * sublane_pack)
    return max(sublane_pack, (bb // sublane_pack) * sublane_pack)


def label_smoothing_loss(pred, target, *, classes, smoothing=0.1, block_b=None):
    """pred: (B, C) float32/bfloat16 logits; target: (B,) int labels. Scalar f32."""
    B, C = pred.shape
    assert C == classes
    confidence = 1.0 - smoothing

    itemsize = jnp.dtype(pred.dtype).itemsize
    sublane_pack = max(8, 32 // itemsize)      # 8 f32, 16 bf16, 32 int8/fp8

    vmem_budget, vmem_limit, n_cores = _tpu_generation_params()

    # Guard: a single minimum-height row tile (plus intermediates) must fit.
    # TODO(synk): fall back to class-axis tiling with online logsumexp here.
    min_tile = sublane_pack * (C * (2 * itemsize + 2 * 4) + 8 * 512)
    if min_tile > vmem_budget:
        raise ValueError(
            f"num_classes={C} too large for the single-row-tile kernel "
            f"(needs {min_tile} B > budget {vmem_budget} B)")

    if block_b is None:
        block_b = _choose_block_b(B, C, itemsize, vmem_budget, sublane_pack)
    block_b = max(sublane_pack, (block_b // sublane_pack) * sublane_pack)

    n_tiles = -(-B // block_b)
    n_par = n_cores if n_tiles >= n_cores else 1
    tiles_per_core = -(-n_tiles // n_par)
    b_pad = n_par * tiles_per_core * block_b

    tgt = target.astype(jnp.int32).reshape(B, 1)
    if b_pad != B:
        pred = jnp.pad(pred, ((0, b_pad - B), (0, 0)))
        tgt = jnp.pad(tgt, ((0, b_pad - B), (0, 0)))

    kernel = functools.partial(
        _label_smoothing_kernel,
        num_classes=classes,
        smoothing=smoothing,
        confidence=confidence,
        total_batch=B,
        block_b=block_b,
        tiles_per_core=tiles_per_core,
    )

    out = pl.pallas_call(
        kernel,
        out_shape=jax.ShapeDtypeStruct((n_par * 8, 128), jnp.float32),
        grid_spec=pltpu.PrefetchScalarGridSpec(
            num_scalar_prefetch=0,
            grid=(n_par, tiles_per_core),
            in_specs=[
                pl.BlockSpec((block_b, C),
                             lambda c, i: (c * tiles_per_core + i, 0)),
                # Target block is tiny; (block_b, 1) layout kept for simplicity
                # (total bytes are negligible vs. the pred stream).
                pl.BlockSpec((block_b, 1),
                             lambda c, i: (c * tiles_per_core + i, 0)),
            ],
            out_specs=pl.BlockSpec((8, 128), lambda c, i: (c, 0)),
            scratch_shapes=[pltpu.VMEM((block_b, 1), jnp.float32)],
        ),
        compiler_params=pltpu.CompilerParams(
            dimension_semantics=("parallel", "arbitrary"),
            vmem_limit_bytes=vmem_limit,
        ),
    )(pred, tgt)

    # Each core broadcast its partial sum over its own (8, 128) output block.
    partials = out[::8, 0]
    return jnp.sum(partials) / jnp.float32(B)


def _reference(pred, target, classes, smoothing=0.1):
    confidence = 1.0 - smoothing
    logp = jax.nn.log_softmax(pred.astype(jnp.float32), axis=-1)
    onehot = jax.nn.one_hot(target, classes, dtype=jnp.float32)
    true_dist = onehot * confidence + (1.0 - onehot) * (smoothing / (classes - 1))
    return jnp.mean(jnp.sum(-true_dist * logp, axis=-1))


if __name__ == "__main__":
    smoothing = 0.1
    key = jax.random.PRNGKey(0)
    k1, k2, k3, k4, k5, k6 = jax.random.split(key, 6)

    # Test 1: small shapes, auto tile (single batch tile, single-core path).
    B, C = 16, 32
    pred = jax.random.normal(k1, (B, C), dtype=jnp.float32)
    target = jax.random.randint(k2, (B,), 0, C, dtype=jnp.int32)
    loss = jax.block_until_ready(
        label_smoothing_loss(pred, target, classes=C, smoothing=smoothing))
    ref = _reference(pred, target, C, smoothing)
    assert jnp.allclose(loss, ref, rtol=1e-5, atol=1e-5), (loss, ref)

    # Test 2: non-multiple batch with explicit small tile -> exercises padding,
    # row masking, multiple grid tiles (and the megacore path on multi-TC chips).
    B2, C2 = 13, 32
    pred2 = jax.random.normal(k3, (B2, C2), dtype=jnp.float32)
    target2 = jax.random.randint(k4, (B2,), 0, C2, dtype=jnp.int32)
    loss2 = jax.block_until_ready(
        label_smoothing_loss(pred2, target2, classes=C2, smoothing=smoothing,
                             block_b=8))
    ref2 = _reference(pred2, target2, C2, smoothing)
    assert jnp.allclose(loss2, ref2, rtol=1e-5, atol=1e-5), (loss2, ref2)

    # Test 3: bfloat16 logits -> exercises the lazy-f32-cast path and the
    # 16-sublane block rounding.
    B3, C3 = 32, 64
    pred3 = jax.random.normal(k5, (B3, C3), dtype=jnp.float32).astype(jnp.bfloat16)
    target3 = jax.random.randint(k6, (B3,), 0, C3, dtype=jnp.int32)
    loss3 = jax.block_until_ready(
        label_smoothing_loss(pred3, target3, classes=C3, smoothing=smoothing))
    ref3 = _reference(pred3, target3, C3, smoothing)
    assert jnp.allclose(loss3, ref3, rtol=2e-2, atol=2e-2), (loss3, ref3)

    print("KERNEL_OK")
</pallas_src>

<mosaic_0001>
module attributes {stable_mosaic.version = 11 : i64} {
  func.func @_label_smoothing_kernel(%arg0: i32, %arg1: i32, %arg2: memref<16x32xf32, #tpu.memory_space<vmem>>, %arg3: memref<16x1xi32, #tpu.memory_space<vmem>>, %arg4: memref<8x128xf32, #tpu.memory_space<vmem>>, %arg5: memref<16x1xf32, #tpu.memory_space<vmem>>) attributes {dimension_semantics = [#tpu.dimension_semantics<parallel>, #tpu.dimension_semantics<arbitrary>], iteration_bounds = array<i64: 1, 1>, scalar_prefetch = 0 : i64, scratch_operands = 1 : i64, tpu.core_type = #tpu.core_type<tc>, window_params = [{transform_indices = @transform_0, window_bounds = array<i64: 16, 32>}, {transform_indices = @transform_1, window_bounds = array<i64: 16, 1>}, {transform_indices = @transform_2, window_bounds = array<i64: 8, 128>}]} {
    %c0_i32 = arith.constant 0 : i32
    %0 = arith.cmpi eq, %arg1, %c0_i32 : i32
    %1 = arith.extui %0 : i1 to i32
    %c0_i32_0 = arith.constant 0 : i32
    %2 = arith.cmpi ne, %1, %c0_i32_0 : i32
    scf.if %2 {
      %cst_16 = arith.constant 0.000000e+00 : f32
      %40 = vector.broadcast %cst_16 : f32 to vector<16x1xf32>
      %c0_17 = arith.constant 0 : index
      %c0_18 = arith.constant 0 : index
      %41 = vector.load %arg5[%c0_17, %c0_18] : memref<16x1xf32, #tpu.memory_space<vmem>>, vector<16x1xf32>
      tpu.vector_store %arg5[%c0_17, %c0_18], %40 {strides = array<i32>} : memref<16x1xf32, #tpu.memory_space<vmem>>, vector<16x1xf32>,
    } else {
    }
    %c0 = arith.constant 0 : index
    %c0_1 = arith.constant 0 : index
    %3 = vector.load %arg2[%c0, %c0_1] : memref<16x32xf32, #tpu.memory_space<vmem>>, vector<16x32xf32>
    %cst = arith.constant dense<0xFF800000> : vector<16xf32>
    %4 = vector.multi_reduction <maximumf>, %3, %cst [1] : vector<16x32xf32> to vector<16xf32>
    %5 = vector.shape_cast %4 : vector<16xf32> to vector<16x1xf32>
    %6 = vector.broadcast %5 : vector<16x1xf32> to vector<16x32xf32>
    %7 = arith.subf %3, %6 : vector<16x32xf32>
    %8 = math.exp %7 : vector<16x32xf32>
    %cst_2 = arith.constant dense<0.000000e+00> : vector<16xf32>
    %9 = vector.multi_reduction <add>, %8, %cst_2 [1] : vector<16x32xf32> to vector<16xf32>
    %10 = vector.shape_cast %9 : vector<16xf32> to vector<16x1xf32>
    %11 = math.log %10 : vector<16x1xf32>
    %c0_3 = arith.constant 0 : index
    %c0_4 = arith.constant 0 : index
    %12 = vector.load %arg3[%c0_3, %c0_4] : memref<16x1xi32, #tpu.memory_space<vmem>>, vector<16x1xi32>
    %13 = tpu.iota {dimensions = array<i32: 1>} : vector<1x32xi32>
    %14 = vector.broadcast %13 : vector<1x32xi32> to vector<16x32xi32>
    %15 = vector.broadcast %12 : vector<16x1xi32> to vector<16x32xi32>
    %16 = arith.cmpi eq, %14, %15 : vector<16x32xi32>
    %cst_5 = arith.constant 0.899999976 : f32
    %cst_6 = arith.constant 0.0032258064 : f32
    %17 = vector.broadcast %cst_5 : f32 to vector<16x32xf32>
    %18 = vector.broadcast %cst_6 : f32 to vector<16x32xf32>
    %19 = arith.select %16, %17, %18 : vector<16x32xi1>, vector<16x32xf32>
    %20 = arith.mulf %19, %7 : vector<16x32xf32>
    %cst_7 = arith.constant dense<0.000000e+00> : vector<16xf32>
    %21 = vector.multi_reduction <add>, %20, %cst_7 [1] : vector<16x32xf32> to vector<16xf32>
    %22 = vector.shape_cast %21 : vector<16xf32> to vector<16x1xf32>
    %23 = arith.subf %11, %22 : vector<16x1xf32>
    %c1_i32 = arith.constant 1 : i32
    %24 = arith.muli %arg0, %c1_i32 : i32
    %25 = arith.addi %24, %arg1 : i32
    %c16_i32 = arith.constant 16 : i32
    %26 = arith.muli %25, %c16_i32 : i32
    %27 = tpu.iota {dimensions = array<i32: 0>} : vector<16x1xi32>
    %28 = vector.broadcast %26 : i32 to vector<16x1xi32>
    %29 = arith.addi %28, %27 : vector<16x1xi32>
    %c0_8 = arith.constant 0 : index
    %c0_9 = arith.constant 0 : index
    %30 = vector.load %arg5[%c0_8, %c0_9] : memref<16x1xf32, #tpu.memory_space<vmem>>, vector<16x1xf32>
    %c16_i32_10 = arith.constant 16 : i32
    %31 = vector.broadcast %c16_i32_10 : i32 to vector<16x1xi32>
    %32 = arith.cmpi slt, %29, %31 : vector<16x1xi32>
    %cst_11 = arith.constant 0.000000e+00 : f32
    %33 = vector.broadcast %cst_11 : f32 to vector<16x1xf32>
    %34 = arith.select %32, %23, %33 : vector<16x1xi1>, vector<16x1xf32>
    %35 = arith.addf %30, %34 : vector<16x1xf32>
    %c0_12 = arith.constant 0 : index
    %c0_13 = arith.constant 0 : index
    %36 = vector.load %arg5[%c0_12, %c0_13] : memref<16x1xf32, #tpu.memory_space<vmem>>, vector<16x1xf32>
    tpu.vector_store %arg5[%c0_12, %c0_13], %35 {strides = array<i32>} : memref<16x1xf32, #tpu.memory_space<vmem>>, vector<16x1xf32>,
    %c0_i32_14 = arith.constant 0 : i32
    %37 = arith.cmpi eq, %arg1, %c0_i32_14 : i32
    %38 = arith.extui %37 : i1 to i32
    %c0_i32_15 = arith.constant 0 : i32
    %39 = arith.cmpi ne, %38, %c0_i32_15 : i32
    scf.if %39 {
      %c0_16 = arith.constant 0 : index
      %c0_17 = arith.constant 0 : index
      %40 = vector.load %arg5[%c0_16, %c0_17] : memref<16x1xf32, #tpu.memory_space<vmem>>, vector<16x1xf32>
      %41 = vector.shape_cast %40 : vector<16x1xf32> to vector<1x16x1xf32>
      %cst_18 = arith.constant dense<0.000000e+00> : vector<1xf32>
      %42 = vector.multi_reduction <add>, %41, %cst_18 [1, 2] : vector<1x16x1xf32> to vector<1xf32>
      %43 = vector.shape_cast %42 : vector<1xf32> to vector<1x1x1xf32>
      %44 = vector.extract %43[0, 0, 0] : f32 from vector<1x1x1xf32>
      %45 = vector.broadcast %44 : f32 to vector<1x1xf32>
      %46 = vector.shape_cast %45 : vector<1x1xf32> to vector<1x1xf32>
      %47 = vector.broadcast %46 : vector<1x1xf32> to vector<8x128xf32>
      %c0_19 = arith.constant 0 : index
      %c0_20 = arith.constant 0 : index
      %48 = vector.load %arg4[%c0_19, %c0_20] : memref<8x128xf32, #tpu.memory_space<vmem>>, vector<8x128xf32>
      tpu.vector_store %arg4[%c0_19, %c0_20], %47 {strides = array<i32>} : memref<8x128xf32, #tpu.memory_space<vmem>>, vector<8x128xf32>,
    } else {
    }
    return
  }
  func.func @transform_0(%arg0: i32, %arg1: i32) -> (i32, i32) {
    %c1_i32 = arith.constant 1 : i32
    %0 = arith.muli %arg0, %c1_i32 : i32
    %1 = arith.addi %0, %arg1 : i32
    %c0_i32 = arith.constant 0 : i32
    %c0_i32_0 = arith.constant 0 : i32
    return %1, %c0_i32 : i32, i32
  }
  func.func @transform_1(%arg0: i32, %arg1: i32) -> (i32, i32) {
    %c1_i32 = arith.constant 1 : i32
    %0 = arith.muli %arg0, %c1_i32 : i32
    %1 = arith.addi %0, %arg1 : i32
    %c0_i32 = arith.constant 0 : i32
    %c0_i32_0 = arith.constant 0 : i32
    return %1, %c0_i32 : i32, i32
  }
  func.func @transform_2(%arg0: i32, %arg1: i32) -> (i32, i32) {
    %c0_i32 = arith.constant 0 : i32
    %c0_i32_0 = arith.constant 0 : i32
    return %arg0, %c0_i32 : i32, i32
  }
}

</mosaic_0001>

<bundles_post_ra>
// kernel: tpu_custom_call.1
= control target key start
LH: loop header
LB: loop body
LE: loop exit
PB: predicated region body
PF: predicated region fallthrough
CT: control target
= control target key end

     0   :  { %vm65_vm0 = vcmask 261120   ;;  %v214_v4 = vmov 0   ;;  %s260_s0 = inlined_call_operand.vmem [shape: f32[16,32], index: 0, kind: input, shape index: {}]   ;;  %s261_s1 = inlined_call_operand.vmem [shape: s32[16,1], index: 1, kind: input, shape index: {}]   ;;  %s262_s2 = inlined_call_operand.hbm [shape: f32[8,128], index: 2, kind: output, shape index: {}]  }
   0x1   :  { %v63_v0 = vld [vmem:[%s260_s0] sm:$0xff]  ;;  %v64_v1 = vld [vmem:[%s260_s0 + $0x8] sm:$0xff]  ;;  %182 = vset.pattern.permute.xlu1 %v214_v4  ;;  %183 = vset.pattern.permute.xlu0 %v214_v4 }
   0x2   :  { %v88_v2 = vld [vmem:[%s261_s1] sm:$0xff]  ;;  %v66_v3 = vsel %vm65_vm0, %v63_v0, -inf }
   0x3   :  { %67 = vmax.xlane.f32.xlu0 %v66_v3  ;;  %93 = vperm.xlu1 %182, %v88_v2  }
   0x4   :  { %7 = vsyncpa [#allocation4], 0  ;;  %v69_v5 = vsel %vm65_vm0, %v64_v1, -inf  ;;  %v89_v6 = vld [vmem:[%s261_s1 + $0x8] sm:$0xff]  ;;  %v90_v11 = vlaneseq  ;;  %v215_v17 = vmov 0.0032258064  }
   0x5   :  { %vm60_vm3 = vcmask 7168   ;;  %v216_v28 = vmov 0.0   ;;  %s217_s0 = smov [#allocation3]  }
   0x6   :  { %v91_v15 = vand.u32 127, %v90_v11  ;;  %61 = vst.msk [vmem:[#allocation2] sm:$0xff] %vm60_vm3, %v216_v28  ;;  %62 = vst.msk [vmem:[#allocation2 + $0x8] sm:$0xff] %vm60_vm3, %v216_v28  ;;  %s156_s1 = sshll.u32 %s217_s0, 4  ;;  %s157_s1 = int_to_ptr.vmem [resolvable:$true] %s156_s1 }
   0x7   :  { %70 = vmax.xlane.f32.xlu0 %v69_v5  ;;  %96 = vperm.xlu1 %182, %v89_v6   ;;  %s192_s18 = scalar_lea.vmem %s157_s1, 128  ;;  %p197_p1 = scmp.lt.s32.totalorder %s157_s1, %s157_s1 }
   0x8   :  { %p193_p0 = scmp.ne.s32.totalorder %s157_s1, %s192_s18  ;;  %p198_p2 = scmp.lt.s32.totalorder %s192_s18, %s192_s18 }
   0xa   :  { %p199_p3 = por %p198_p2, %p197_p1 }
   0xc   :  { %p200_p4 = pnand %p199_p3, %p193_p0 }
   0xd   :  { %v120_v34 = vld [vmem:[#allocation2] sm:$0xff]  ;;  %v121_v40 = vld [vmem:[#allocation2 + $0x8] sm:$0xff] }
  0x7e   :  { %v94_v14 = vpop.permute.xlu1 %93 }
  0x7f   :  { %vm98_vm1 = vcmp.eq.s32.totalorder %v91_v15, %v94_v14 }
  0x80   :  { %v100_v18 = vsel %vm98_vm1, 0.9, %v215_v17 }
  0x82   :  { %v97_v16 = vpop.permute.xlu1 %96 }
  0x83   :  { %vm99_vm2 = vcmp.eq.s32.totalorder %v91_v15, %v97_v16 }
  0x84   :  { %v101_v22 = vsel %vm99_vm2, 0.9, %v215_v17 }
  0x8c   :  { %v68_v7 = vpop.xlane.xlu0 %67 }
  0x8d   :  { %v72_v8 = vsub.f32 %v63_v0, %v68_v7 }
  0x8f   :  { %v74_v9 = vmul.f32 1.442695, %v72_v8  ;;  %v102_v21 = vmul.f32 %v100_v18, %v72_v8 }
  0x90   :  { %v71_v10 = vpop.xlane.xlu0 %70 }
  0x91   :  { %184 = vpow2.f32 %v74_v9  ;;  %v73_v12 = vsub.f32 %v64_v1, %v71_v10  ;;  %v104_v24 = vsel %vm65_vm0, %v102_v21, 0.0 }
  0x93   :  { %v76_v13 = vmul.f32 1.442695, %v73_v12  ;;  %v103_v26 = vmul.f32 %v101_v22, %v73_v12 }
  0x95   :  { %186 = vpow2.f32 %v76_v13  ;;  %v107_v27 = vsel %vm65_vm0, %v103_v26, 0.0 }
  0x9e   :  { %v185_v19 = vpop.eup %184 }
  0x9f   :  { %v78_v20 = vsel %vm65_vm0, %v185_v19, 0.0 }
  0xa0   :  { %79 = vadd.xlane.f32.xlu0 %v78_v20 }
  0xa2   :  { %v187_v23 = vpop.eup %186 }
  0xa3   :  { %v81_v25 = vsel %vm65_vm0, %v187_v23, 0.0 }
  0xa4   :  { %105 = vadd.xlane.f32.xlu0 %v104_v24  ;;  %82 = vadd.xlane.f32.xlu1 %v81_v25 }
  0xa8   :  { %108 = vadd.xlane.f32.xlu0 %v107_v27 }
 0x129   :  { %v80_v29 = vpop.xlane.xlu0 %79 }
 0x12a   :  { %188 = vlog2.f32 %v80_v29 }
 0x12d   :  { %v83_v30 = vpop.xlane.xlu1 %82  ;;  %v106_v32 = vpop.xlane.xlu0 %105 }
 0x12e   :  { %190 = vlog2.f32 %v83_v30 }
 0x131   :  { %v109_v39 = vpop.xlane.xlu0 %108 }
 0x137   :  { %v189_v31 = vpop.eup %188 }
 0x138   :  { %v85_v33 = vmul.f32 0.6931472, %v189_v31 }
 0x13a   :  { %v110_v35 = vsub.f32 %v85_v33, %v106_v32 }
 0x13b   :  { %v191_v36 = vpop.eup %190 }
 0x13c   :  { %v126_v37 = vadd.f32 %v120_v34, %v110_v35  ;;  %v87_v38 = vmul.f32 0.6931472, %v191_v36 }
 0x13e   :  { %129 = vst.msk [vmem:[#allocation2] sm:$0xff] %vm60_vm3, %v126_v37  ;;  %v111_v41 = vsub.f32 %v87_v38, %v109_v39 }
 0x140   :  { %v127_v42 = vadd.f32 %v121_v40, %v111_v41 }
 0x142   :  { %130 = vst.msk [vmem:[#allocation2 + $0x8] sm:$0xff] %vm60_vm3, %v127_v42 }
 0x145   :  { %v134_v43 = vld [vmem:[#allocation2] sm:$0xff] }
 0x146   :  { %v136_v45 = vsel %vm60_vm3, %v134_v43, 0.0 }
 0x149   :  { %v135_v44 = vld [vmem:[#allocation2 + $0x8] sm:$0xff] }
 0x14a   :  { %v137_v46 = vsel %vm60_vm3, %v135_v44, 0.0 }
 0x14b   :  { %v138_v47 = vadd.f32 %v137_v46, %v136_v45 }
 0x14d   :  { %139 = vadd.xlane.f32.xlu0 %v138_v47 }
 0x1d6   :  { %v140_v48 = vpop.xlane.xlu0 %139 }
 0x1d7   :  { %v141_v49 = vrot.slane %v140_v48, 4 }
 0x1d9   :  { %v142_v50 = vadd.f32 %v141_v49, %v140_v48 }
 0x1db   :  { %v143_v51 = vrot.slane %v142_v50, 2 }
 0x1dd   :  { %v144_v52 = vadd.f32 %v143_v51, %v142_v50 }
 0x1df   :  { %v145_v53 = vrot.slane %v144_v52, 1 }
 0x1e1   :  { %v146_v54 = vadd.f32 %v145_v53, %v144_v52 }
 0x1e3   :  { %176 = vpush %v146_v54 }
 0x214   :  { %s177_s17 = spop %176 }
 0x215   :  { %v148_v55 = vstv %s177_s17 }
 0x216   :  { %149 = vst [vmem:[#allocation3] sm:$0xff] %v148_v55 }
 0x217   :  { %203 = shalt.err (!%p200_p4)
}
 0x218   :  { %159 = dma.vmem_to_hbm [thread:$0]  %s157_s1, 128, %s262_s2, [#allocation4]  }
 0x219   :  { %212 = dma.done.wait [#allocation4], 128  }
 0x21a   :  { %213 = vsyncadd [#allocation4], 4294967168 }
 0x21b   :  { %163 = vsyncpa [#allocation4], 1 }

</bundles_post_ra>
